<compile_context>
chip_gen: v6e
topology: v6e:2x2x1
jax: 0.10.0
libtpu: 0.0.40
codegen_flags: <defaults>
</compile_context>

<pallas_src>
import math

import jax
import jax.numpy as jnp
from jax.experimental import pallas as pl
from jax.experimental.pallas import tpu as pltpu


_VMEM_LIMIT_BYTES = 48 * 1024 * 1024          # safe budget on v5e / v6e / v7x
_TARGET_BLOCK_BYTES = _VMEM_LIMIT_BYTES // 6  # in + out, double-buffered, + headroom


def _spatial_se_kernel(w_ref, b_ref, x_ref, o_ref):
    # w_ref : VMEM (1, C, 1) f32   1x1-conv weight, resident across all grid steps
    # b_ref : SMEM (1, 1)    f32   conv bias
    # x_ref : VMEM (TB, C, T)      input block (native dtype)
    # o_ref : VMEM (TB, C, T)
    x = x_ref[...]
    w = w_ref[...].astype(x.dtype)                                      # (1, C, 1)
    # Channel contraction on the VPU (multiply) + XLU (sublane reduce), f32 accum.
    logit = jnp.sum((x * w).astype(jnp.float32), axis=1, keepdims=True)  # (TB,1,T)
    attn = jax.nn.sigmoid(logit + b_ref[0, 0])                          # EUP
    o_ref[...] = (x * attn.astype(x.dtype)).astype(o_ref.dtype)         # sublane bcast


def spatial_se_forward(x, conv_w, conv_b, *, tile_hw=None, batch_block=None):
    """x: (B, C, H, W). conv_w: (1, C, 1, 1) 1x1-conv weight. conv_b: (1,) bias."""
    b, c, h, w_sp = x.shape
    hw = h * w_sp
    itemsize = jnp.dtype(x.dtype).itemsize
    hw128 = ((hw + 127) // 128) * 128            # lane-tile upper bound for one image

    # Lane tile: multiple of 128, sized by bytes (~8 MiB block), never more than
    # one image's (padded) HW.
    if tile_hw is None:
        per_lane_bytes = max(c * itemsize, 1)
        tile_hw = (_TARGET_BLOCK_BYTES // per_lane_bytes) // 128 * 128
    tile_hw = int(max(128, min(((tile_hw + 127) // 128) * 128, hw128)))

    # When a single tile covers a whole image, block over batch as well so each
    # grid step still moves a multi-MiB slab.
    if batch_block is None:
        batch_block = 1
        if tile_hw >= hw128:
            block_bytes = max(c * tile_hw * itemsize, 1)
            batch_block = int(max(1, min(b, _TARGET_BLOCK_BYTES // block_bytes)))
    tb = int(batch_block)

    x2 = x.reshape(b, c, hw)                                 # free reshape
    w_col = conv_w.reshape(1, c, 1).astype(jnp.float32)
    bias = conv_b.reshape(1, 1).astype(jnp.float32)

    grid = (pl.cdiv(b, tb), pl.cdiv(hw, tile_hw))
    out = pl.pallas_call(
        _spatial_se_kernel,
        out_shape=jax.ShapeDtypeStruct((b, c, hw), x.dtype),
        grid=grid,
        in_specs=[
            # Constant block index -> copied once, stays resident in VMEM.
            pl.BlockSpec((1, c, 1), lambda i, j: (0, 0, 0)),
            pl.BlockSpec((1, 1), lambda i, j: (0, 0),
                         memory_space=pltpu.MemorySpace.SMEM),
            pl.BlockSpec((tb, c, tile_hw), lambda i, j: (i, 0, j)),
        ],
        out_specs=pl.BlockSpec((tb, c, tile_hw), lambda i, j: (i, 0, j)),
        compiler_params=pltpu.CompilerParams(
            dimension_semantics=("parallel", "parallel"),
            vmem_limit_bytes=_VMEM_LIMIT_BYTES,
        ),
    )(w_col, bias, x2)
    return out.reshape(b, c, h, w_sp)


def spatial_se_reference(x, conv_w, conv_b):
    """Plain-JAX reference (elementwise-exact f32, no matmul)."""
    c = x.shape[1]
    w = conv_w.reshape(1, c, 1, 1)
    s = jnp.sum(x * w, axis=1, keepdims=True) + conv_b.reshape(())
    return x * jax.nn.sigmoid(s)


if __name__ == "__main__":
    B, C, H, W = 2, 4, 16, 16
    key = jax.random.PRNGKey(0)
    kx, kw, kb = jax.random.split(key, 3)
    x = jax.random.normal(kx, (B, C, H, W), dtype=jnp.float32)
    # Deterministic Conv2d(C, 1, 1) params, kaiming-uniform-like bound (fan_in = C).
    bound = 1.0 / math.sqrt(C)
    conv_w = jax.random.uniform(kw, (1, C, 1, 1), minval=-bound, maxval=bound,
                                dtype=jnp.float32)
    conv_b = jax.random.uniform(kb, (1,), minval=-bound, maxval=bound,
                                dtype=jnp.float32)

    out = jax.block_until_ready(spatial_se_forward(x, conv_w, conv_b))
    ref = spatial_se_reference(x, conv_w, conv_b)
    assert out.shape == (B, C, H, W)
    assert jnp.max(jnp.abs(out - ref)) < 1e-4, "mismatch vs reference"

    # Ragged single-tile path (HW = 49 < 128): masked stores on the only block.
    x7 = jax.random.normal(jax.random.PRNGKey(1), (B, C, 7, 7), dtype=jnp.float32)
    out7 = jax.block_until_ready(spatial_se_forward(x7, conv_w, conv_b))
    ref7 = spatial_se_reference(x7, conv_w, conv_b)
    assert jnp.max(jnp.abs(out7 - ref7)) < 1e-4, "mismatch vs reference (ragged HW)"

    # Multi-step grid + ragged last HW tile (HW = 200, forced 128-lane tiles).
    x3 = jax.random.normal(jax.random.PRNGKey(2), (B, C, 10, 20), dtype=jnp.float32)
    out3 = jax.block_until_ready(spatial_se_forward(x3, conv_w, conv_b, tile_hw=128))
    ref3 = spatial_se_reference(x3, conv_w, conv_b)
    assert jnp.max(jnp.abs(out3 - ref3)) < 1e-4, "mismatch vs reference (multi-tile)"

    print("KERNEL_OK")
</pallas_src>

<mosaic_0001>
module attributes {stable_mosaic.version = 11 : i64} {
  func.func @_spatial_se_kernel(%arg0: i32, %arg1: i32, %arg2: memref<1x4x1xf32, #tpu.memory_space<vmem>>, %arg3: memref<1x1xf32, #tpu.memory_space<smem>>, %arg4: memref<2x4x256xf32, #tpu.memory_space<vmem>>, %arg5: memref<2x4x256xf32, #tpu.memory_space<vmem>>) attributes {dimension_semantics = [#tpu.dimension_semantics<parallel>, #tpu.dimension_semantics<parallel>], iteration_bounds = array<i64: 1, 1>, scalar_prefetch = 0 : i64, scratch_operands = 0 : i64, tpu.core_type = #tpu.core_type<tc>, window_params = [{pipeline_mode = #tpu.pipeline_mode<synchronous>, transform_indices = @transform_0, window_bounds = array<i64: 1, 4, 1>}, {transform_indices = @transform_1, window_bounds = array<i64: 1, 1>}, {transform_indices = @transform_2, window_bounds = array<i64: 2, 4, 256>}, {transform_indices = @transform_3, window_bounds = array<i64: 2, 4, 256>}]} {
    %c0 = arith.constant 0 : index
    %c0_0 = arith.constant 0 : index
    %c0_1 = arith.constant 0 : index
    %0 = vector.load %arg4[%c0, %c0_0, %c0_1] : memref<2x4x256xf32, #tpu.memory_space<vmem>>, vector<2x4x256xf32>
    %c0_2 = arith.constant 0 : index
    %c0_3 = arith.constant 0 : index
    %c0_4 = arith.constant 0 : index
    %1 = vector.load %arg2[%c0_2, %c0_3, %c0_4] : memref<1x4x1xf32, #tpu.memory_space<vmem>>, vector<1x4x1xf32>
    %2 = vector.broadcast %1 : vector<1x4x1xf32> to vector<2x4x256xf32>
    %3 = arith.mulf %0, %2 : vector<2x4x256xf32>
    %cst = arith.constant dense<0.000000e+00> : vector<2x256xf32>
    %4 = vector.multi_reduction <add>, %3, %cst [1] : vector<2x4x256xf32> to vector<2x256xf32>
    %5 = vector.shape_cast %4 : vector<2x256xf32> to vector<2x1x256xf32>
    %c0_5 = arith.constant 0 : index
    %c0_6 = arith.constant 0 : index
    %6 = memref.load %arg3[%c0_5, %c0_6] : memref<1x1xf32, #tpu.memory_space<smem>>
    %7 = vector.broadcast %6 : f32 to vector<2x1x256xf32>
    %8 = arith.addf %5, %7 : vector<2x1x256xf32>
    %9 = arith.negf %8 : vector<2x1x256xf32>
    %10 = math.exp %9 : vector<2x1x256xf32>
    %cst_7 = arith.constant 1.000000e+00 : f32
    %11 = vector.broadcast %cst_7 : f32 to vector<2x1x256xf32>
    %12 = arith.addf %11, %10 : vector<2x1x256xf32>
    %13 = arith.divf %11, %12 : vector<2x1x256xf32>
    %14 = vector.broadcast %13 : vector<2x1x256xf32> to vector<2x4x256xf32>
    %15 = arith.mulf %0, %14 : vector<2x4x256xf32>
    %c0_8 = arith.constant 0 : index
    %c0_9 = arith.constant 0 : index
    %c0_10 = arith.constant 0 : index
    %16 = vector.load %arg5[%c0_8, %c0_9, %c0_10] : memref<2x4x256xf32, #tpu.memory_space<vmem>>, vector<2x4x256xf32>
    tpu.vector_store %arg5[%c0_8, %c0_9, %c0_10], %15 {strides = array<i32>} : memref<2x4x256xf32, #tpu.memory_space<vmem>>, vector<2x4x256xf32>,
    return
  }
  func.func @transform_0(%arg0: i32, %arg1: i32) -> (i32, i32, i32) {
    %c0_i32 = arith.constant 0 : i32
    %c0_i32_0 = arith.constant 0 : i32
    %c0_i32_1 = arith.constant 0 : i32
    %c0_i32_2 = arith.constant 0 : i32
    return %c0_i32, %c0_i32_0, %c0_i32_1 : i32, i32, i32
  }
  func.func @transform_1(%arg0: i32, %arg1: i32) -> (i32, i32) {
    %c0_i32 = arith.constant 0 : i32
    %c0_i32_0 = arith.constant 0 : i32
    %c0_i32_1 = arith.constant 0 : i32
    return %c0_i32, %c0_i32_0 : i32, i32
  }
  func.func @transform_2(%arg0: i32, %arg1: i32) -> (i32, i32, i32) {
    %c0_i32 = arith.constant 0 : i32
    %c0_i32_0 = arith.constant 0 : i32
    return %arg0, %c0_i32, %arg1 : i32, i32, i32
  }
  func.func @transform_3(%arg0: i32, %arg1: i32) -> (i32, i32, i32) {
    %c0_i32 = arith.constant 0 : i32
    %c0_i32_0 = arith.constant 0 : i32
    return %arg0, %c0_i32, %arg1 : i32, i32, i32
  }
}

</mosaic_0001>

<bundles_post_ra>
// kernel: tpu_custom_call.1
= control target key start
LH: loop header
LB: loop body
LE: loop exit
PB: predicated region body
PF: predicated region fallthrough
CT: control target
= control target key end

     0   :  { %9 = vsyncpa [#allocation4], 0  ;;  %s264_s0 = inlined_call_operand.vmem [shape: f32[1,4,1], index: 0, kind: input, shape index: {}]   ;;  %s265_s1 = inlined_call_operand.<no memory space> [shape: f32[1,1], index: 1, kind: input, shape index: {}]   ;;  %s266_s2 = inlined_call_operand.hbm [shape: f32[2,4,256], index: 2, kind: input, shape index: {}]   ;;  %s267_s3 = inlined_call_operand.hbm [shape: f32[2,4,256], index: 3, kind: output, shape index: {}]  }
   0x1   :  { %10 = vsyncpa [#allocation5], 0  ;;  %s212_s12 = smov [#allocation3]  }
   0x2   :  { %s20_s13 = sshll.u32 %s212_s12, 4  ;;  %s21_s13 = int_to_ptr.vmem [resolvable:$true] %s20_s13 }
   0x3   :  { %s176_s14 = scalar_lea.vmem %s21_s13, 256  ;;  %p181_p1 = scmp.lt.s32.totalorder %s21_s13, %s21_s13 }
   0x4   :  { %p177_p0 = scmp.ne.s32.totalorder %s21_s13, %s176_s14  ;;  %p182_p2 = scmp.lt.s32.totalorder %s176_s14, %s176_s14 }
   0x6   :  { %p183_p3 = por %p182_p2, %p181_p1 }
   0x8   :  { %p184_p4 = pnand %p183_p3, %p177_p0 }
   0xa   :  { %187 = shalt.err (!%p184_p4)
}
   0xb   :  { %s213_s15 = smov 128   ;;  %s214_s16 = smov 8  }
   0xc   :  { %26 = dma.hbm_to_vmem [thread:$0]  %s266_s2, 256, %s21_s13, [#allocation4], %s213_s15, %s213_s15, %s214_s16  }
   0xd   :  { %208 = dma.done.wait [#allocation4], 256  }
   0xe   :  { %209 = vsyncadd [#allocation4], 4294967040  ;;  %v215_v0 = vmov 0   ;;  %v32_v1 = vld [vmem:[%s264_s0] sm:$0xf]  ;;  %v40_v4 = vlaneseq  ;;  %v249_v10 = vld [vmem:[#allocation3 + $0x8] sm:$0xff]  ;;  %v83_v38 = vstv %s265_s1 }
   0xf   :  { %151 = vset.pattern.permute.xlu0 %v215_v0  ;;  %v216_v2 = vmov 839922192   ;;  %v247_v9 = vld [vmem:[#allocation3] sm:$0xff]  ;;  %vm53_vm0 = vcmask 1043456   ;;  %s217_s1 = smov [#allocation6]  }
  0x10   :  { %35 = vperm.xlu0 %151, %v32_v1   ;;  %v38_v3 = vunpack.c.l.s4 %v216_v2  ;;  %v41_v6 = vshrl.u32 %v40_v4, 7  ;;  %s129_s21 = sshll.u32 %s217_s1, 4  ;;  %s130_s21 = int_to_ptr.vmem [resolvable:$true] %s129_s21 }
  0x11   :  { %s188_s22 = scalar_lea.vmem %s130_s21, 256  ;;  %p193_p6 = scmp.lt.s32.totalorder %s130_s21, %s130_s21 }
  0x12   :  { %v39_v5 = vunpack.c.0.s8 %v38_v3  ;;  %p189_p5 = scmp.ne.s32.totalorder %s130_s21, %s188_s22  ;;  %p194_p7 = scmp.lt.s32.totalorder %s188_s22, %s188_s22 }
  0x14   :  { %v42_v7 = vsub.s32 %v39_v5, %v41_v6  ;;  %p195_p8 = por %p194_p7, %p193_p6 }
  0x16   :  { %p196_p9 = pnand %p195_p8, %p189_p5 }
  0x8b   :  { %v36_v8 = vpop.permute.xlu0 %35 }
  0x8c   :  { %v43_v11 = vrot.slane %v36_v8, %v42_v7 }
  0x8e   :  { %v45_v12 = vmul.f32 %v43_v11, %v247_v9  ;;  %v46_v13 = vmul.f32 %v43_v11, %v249_v10 }
  0x90   :  { %v49_v14 = vcombine.high %v45_v12, %v45_v12  ;;  %v50_v15 = vcombine.high %v46_v13, %v46_v13  ;;  %v54_v16 = vsel %vm53_vm0, %v45_v12, 0.0  ;;  %v68_v17 = vsel %vm53_vm0, %v46_v13, 0.0 }
  0x91   :  { %v55_v18 = vrot.slane %v54_v16, 4  ;;  %v69_v19 = vrot.slane %v68_v17, 4 }
  0x92   :  { %v61_v20 = vsel %vm53_vm0, %v49_v14, 0.0  ;;  %v75_v21 = vsel %vm53_vm0, %v50_v15, 0.0 }
  0x93   :  { %v56_v22 = vadd.f32 %v55_v18, %v54_v16  ;;  %v62_v23 = vrot.slane %v61_v20, 4  ;;  %v70_v24 = vadd.f32 %v69_v19, %v68_v17  ;;  %v76_v25 = vrot.slane %v75_v21, 4 }
  0x95   :  { %v57_v26 = vrot.slane %v56_v22, 2  ;;  %v63_v27 = vadd.f32 %v62_v23, %v61_v20  ;;  %v71_v28 = vrot.slane %v70_v24, 2  ;;  %v77_v29 = vadd.f32 %v76_v25, %v75_v21 }
  0x97   :  { %v58_v30 = vadd.f32 %v57_v26, %v56_v22  ;;  %v64_v31 = vrot.slane %v63_v27, 2  ;;  %v72_v32 = vadd.f32 %v71_v28, %v70_v24  ;;  %v78_v33 = vrot.slane %v77_v29, 2 }
  0x99   :  { %v59_v34 = vrot.slane %v58_v30, 1  ;;  %v65_v35 = vadd.f32 %v64_v31, %v63_v27  ;;  %v73_v36 = vrot.slane %v72_v32, 1  ;;  %v79_v37 = vadd.f32 %v78_v33, %v77_v29 }
  0x9b   :  { %v60_v39 = vadd.f32 %v59_v34, %v58_v30  ;;  %v66_v40 = vrot.slane %v65_v35, 1  ;;  %v74_v41 = vadd.f32 %v73_v36, %v72_v32  ;;  %v80_v42 = vrot.slane %v79_v37, 1 }
  0x9d   :  { %v67_v43 = vadd.f32 %v66_v40, %v65_v35  ;;  %v81_v44 = vadd.f32 %v80_v42, %v79_v37  ;;  %v84_v45 = vadd.f32 %v83_v38, %v60_v39  ;;  %v86_v46 = vadd.f32 %v83_v38, %v74_v41 }
  0x9f   :  { %v85_v47 = vadd.f32 %v83_v38, %v67_v43  ;;  %v87_v48 = vadd.f32 %v83_v38, %v81_v44  ;;  %v141_v49 = vmul.f32 -1.442695, %v84_v45  ;;  %v143_v50 = vmul.f32 -1.442695, %v86_v46 }
  0xa1   :  { %152 = vpow2.f32 %v141_v49  ;;  %v142_v51 = vmul.f32 -1.442695, %v85_v47  ;;  %v144_v52 = vmul.f32 -1.442695, %v87_v48 }
  0xa2   :  { %154 = vpow2.f32 %v143_v50 }
  0xa3   :  { %156 = vpow2.f32 %v142_v51 }
  0xa4   :  { %158 = vpow2.f32 %v144_v52 }
  0xae   :  { %v153_v53 = vpop.eup %152 }
  0xaf   :  { %v155_v54 = vpop.eup %154  ;;  %v100_v55 = vadd.f32 1.0, %v153_v53 }
  0xb0   :  { %v157_v56 = vpop.eup %156  ;;  %v102_v57 = vadd.f32 1.0, %v155_v54 }
  0xb1   :  { %v159_v58 = vpop.eup %158  ;;  %v101_v59 = vadd.f32 1.0, %v157_v56  ;;  %160 = vrcp.f32 %v100_v55 }
  0xb2   :  { %v103_v60 = vadd.f32 1.0, %v159_v58  ;;  %162 = vrcp.f32 %v102_v57 }
  0xb3   :  { %164 = vrcp.f32 %v101_v59 }
  0xb4   :  { %166 = vrcp.f32 %v103_v60 }
  0xbe   :  { %v161_v61 = vpop.eup %160 }
  0xbf   :  { %v163_v62 = vpop.eup %162 }
  0xc0   :  { %v165_v63 = vpop.eup %164 }
  0xc1   :  { %v167_v0 = vpop.eup %166  ;;  %v116_v1 = vcombine.low %v161_v61, %v165_v63 }
  0xc2   :  { %v117_v2 = vcombine.low %v163_v62, %v167_v0 }
  0xc3   :  { %v120_v3 = vmul.f32 %v116_v1, %v247_v9 }
  0xc4   :  { %v121_v4 = vmul.f32 %v117_v2, %v249_v10 }
  0xc5   :  { %122 = vst [vmem:[#allocation6] sm:$0xff] %v120_v3 }
  0xc6   :  { %123 = vst [vmem:[#allocation6 + $0x8] sm:$0xff] %v121_v4 }
  0xc7   :  { %199 = shalt.err (!%p196_p9)
}
  0xc8   :  { %135 = dma.vmem_to_hbm [thread:$0]  %s130_s21, 256, %s267_s3, [#allocation5], %s213_s15, %s213_s15, %s214_s16  }
  0xc9   :  { %210 = dma.done.wait [#allocation5], 256  }
  0xca   :  { %211 = vsyncadd [#allocation5], 4294967040 }
  0xcb   :  { %139 = vsyncpa [#allocation4], 1 }
  0xcc   :  { %140 = vsyncpa [#allocation5], 1 }

</bundles_post_ra>
